<compile_context>
chip_gen: v5e
topology: v5e:2x2
jax: 0.10.0
libtpu: 0.0.40
codegen_flags: <defaults>
</compile_context>

<pallas_src>
import functools

import jax
import jax.numpy as jnp
from jax.experimental import pallas as pl
from jax.experimental.pallas import tpu as pltpu

HIDDEN = 768
NUM_CLASSES = 80
PADDED_CLASSES = 128          # lane-dense class axis for matmul + softmax
NEG_BIG = -1e30               # bias fill for pad classes -> exp underflows to 0


# ---------------------------------------------------------------------------
# Pallas kernel: linear (768 -> 128-padded) + softmax, store first 80 classes.
# ---------------------------------------------------------------------------
def cta_head_kernel(x_ref, w_ref, b_ref, o_ref):
    # x_ref: [tb, 768] f32   (cast to bf16 here -> no extra wrapper HBM pass)
    # w_ref: [768, 128] bf16 (constant index_map -> stays resident in VMEM)
    # b_ref: [1, 128]  f32   (pad columns = -1e30)
    # o_ref: [tb, 80]  f32
    x = x_ref[...].astype(jnp.bfloat16)
    logits = (
        jnp.dot(x, w_ref[...], preferred_element_type=jnp.float32) + b_ref[...]
    )
    # numerically stable softmax over the class axis, all in f32
    m = jnp.max(logits, axis=1, keepdims=True)
    e = jnp.exp(logits - m)
    denom = jnp.sum(e, axis=1, keepdims=True)
    probs = e / denom                      # exact divide (approx recip broke sum==1)
    o_ref[...] = probs[:, :NUM_CLASSES]    # masked store into 80-wide output


def cta_head(cls_hidden, w_t_padded_bf16, bias_padded_f32, *, tb_max=1024):
    """cls_hidden: [B, 768] f32 -> probs [B, 80] f32."""
    B = cls_hidden.shape[0]

    # Small batch: one full-array block (block dim == array dim is always legal).
    # Large batch: 1024-row tiles (multiple of 8); Pallas masks a trailing
    # partial block, so no jnp.pad of the activations is needed.
    tb = B if B <= tb_max else tb_max
    grid = (pl.cdiv(B, tb),)

    cost = pl.CostEstimate(
        flops=2 * B * HIDDEN * PADDED_CLASSES,
        transcendentals=B * PADDED_CLASSES,
        bytes_accessed=(
            B * HIDDEN * 4                      # x (f32)
            + HIDDEN * PADDED_CLASSES * 2       # W (bf16)
            + PADDED_CLASSES * 4                # bias
            + B * NUM_CLASSES * 4               # probs out
        ),
    )

    return pl.pallas_call(
        cta_head_kernel,
        out_shape=jax.ShapeDtypeStruct((B, NUM_CLASSES), jnp.float32),
        grid_spec=pltpu.PrefetchScalarGridSpec(
            num_scalar_prefetch=0,
            grid=grid,
            in_specs=[
                pl.BlockSpec((tb, HIDDEN), lambda i: (i, 0)),
                # constant index_map -> weight/bias blocks stay resident in VMEM
                pl.BlockSpec((HIDDEN, PADDED_CLASSES), lambda i: (0, 0)),
                pl.BlockSpec((1, PADDED_CLASSES), lambda i: (0, 0)),
            ],
            out_specs=pl.BlockSpec((tb, NUM_CLASSES), lambda i: (i, 0)),
        ),
        compiler_params=pltpu.CompilerParams(
            # batch axis is embarrassingly parallel -> megacore sharding on v7x
            dimension_semantics=("parallel",),
            vmem_limit_bytes=32 * 1024 * 1024,
        ),
        cost_estimate=cost,
    )(cls_hidden, w_t_padded_bf16, bias_padded_f32)


# ---------------------------------------------------------------------------
# Deterministic stand-in for the frozen `pretrained` encoder (plain JAX glue).
# TODO(synk): the real pretrained transformer (BERT-style) is an external
# frozen module and is not re-implemented here; this embedding-sum stand-in
# produces a deterministic CLS hidden state of the correct shape/dtype.
# Only the CLS-token row is gathered (the full [B, S, 768] last_hidden_state
# is never materialized since CTAModel only uses last_hidden_state[:, 0]).
# ---------------------------------------------------------------------------
def make_pretrained_params(key, vocab_size=128, type_vocab_size=2, max_seq=64):
    k1, k2, k3 = jax.random.split(key, 3)
    return {
        "word_emb": jax.random.normal(k1, (vocab_size, HIDDEN), jnp.float32) * 0.02,
        "type_emb": jax.random.normal(k2, (type_vocab_size, HIDDEN), jnp.float32) * 0.02,
        "pos_emb": jax.random.normal(k3, (max_seq, HIDDEN), jnp.float32) * 0.02,
    }


def pretrained_cls_forward(params, input_ids, attention_mask, token_type_ids):
    # Equivalent to pretrained_forward(...)[:, 0], but only touches the CLS row.
    cls = (
        params["word_emb"][input_ids[:, 0]]
        + params["type_emb"][token_type_ids[:, 0]]
        + params["pos_emb"][0][None, :]
    )
    cls = cls * attention_mask[:, 0, None].astype(jnp.float32)
    return cls  # [B, 768]


# ---------------------------------------------------------------------------
# Full CTAModel forward
# ---------------------------------------------------------------------------
@jax.jit
def cta_model_forward(params, input_ids, attention_mask, token_type_ids):
    cls_hidden = pretrained_cls_forward(
        params["pretrained"], input_ids, attention_mask, token_type_ids
    )  # [B, 768] f32 — passed straight to the kernel (cast happens in-kernel)
    return cta_head(cls_hidden, params["w_t_padded_bf16"], params["bias_padded"])


def reference_forward(params, input_ids, attention_mask, token_type_ids):
    cls_hidden = pretrained_cls_forward(
        params["pretrained"], input_ids, attention_mask, token_type_ids
    )
    # Match the kernel's bf16-input / f32-accumulate matmul precision.
    logits = (
        jnp.dot(
            cls_hidden.astype(jnp.bfloat16),
            params["w_t"].astype(jnp.bfloat16),
            preferred_element_type=jnp.float32,
        )
        + params["bias"]
    )
    return jax.nn.softmax(logits, axis=1)


if __name__ == "__main__":
    key = jax.random.PRNGKey(0)
    k_pre, k_w, k_b, k_ids, k_types = jax.random.split(key, 5)

    B, S = 2, 8
    vocab_size = 128

    # nn.Linear(768, 80): weight [80, 768], bias [80]
    linear_weight = jax.random.normal(k_w, (NUM_CLASSES, HIDDEN), jnp.float32) * 0.02
    linear_bias = jax.random.normal(k_b, (NUM_CLASSES,), jnp.float32) * 0.02

    # Host-side one-time prep: transpose + pad class axis to 128 lanes.
    w_t = linear_weight.T                                              # [768, 80] f32
    w_t_padded = jnp.pad(w_t, ((0, 0), (0, PADDED_CLASSES - NUM_CLASSES)))
    bias_padded = jnp.pad(
        linear_bias.reshape(1, NUM_CLASSES),
        ((0, 0), (0, PADDED_CLASSES - NUM_CLASSES)),
        constant_values=NEG_BIG,
    )  # [1, 128] f32

    params = {
        "pretrained": make_pretrained_params(k_pre, vocab_size=vocab_size, max_seq=S),
        "w_t": w_t,                                                    # f32 (reference)
        "bias": linear_bias,                                           # f32 (reference)
        "w_t_padded_bf16": w_t_padded.astype(jnp.bfloat16),            # [768, 128] bf16
        "bias_padded": bias_padded,                                    # [1, 128] f32
    }

    input_ids = jax.random.randint(k_ids, (B, S), 0, vocab_size, dtype=jnp.int32)
    token_type_ids = jax.random.randint(k_types, (B, S), 0, 2, dtype=jnp.int32)
    attention_mask = jnp.ones((B, S), dtype=jnp.int32)

    out = cta_model_forward(params, input_ids, attention_mask, token_type_ids)
    out = jax.block_until_ready(out)

    ref = reference_forward(params, input_ids, attention_mask, token_type_ids)

    assert out.shape == (B, NUM_CLASSES)
    assert jnp.allclose(jnp.sum(out, axis=1), 1.0, atol=1e-4)
    assert jnp.allclose(out, ref, atol=5e-4, rtol=5e-4)

    print("KERNEL_OK")
</pallas_src>

<mosaic_0001>
module attributes {stable_mosaic.version = 11 : i64} {
  func.func @cta_head_kernel(%arg0: i32, %arg1: memref<2x768xf32, #tpu.memory_space<vmem>>, %arg2: memref<768x128xbf16, #tpu.memory_space<vmem>>, %arg3: memref<1x128xf32, #tpu.memory_space<vmem>>, %arg4: memref<2x80xf32, #tpu.memory_space<vmem>>) attributes {dimension_semantics = [#tpu.dimension_semantics<parallel>], iteration_bounds = array<i64: 1>, scalar_prefetch = 0 : i64, scratch_operands = 0 : i64, tpu.core_type = #tpu.core_type<tc>, window_params = [{transform_indices = @transform_0, window_bounds = array<i64: 2, 768>}, {pipeline_mode = #tpu.pipeline_mode<synchronous>, transform_indices = @transform_1, window_bounds = array<i64: 768, 128>}, {pipeline_mode = #tpu.pipeline_mode<synchronous>, transform_indices = @transform_2, window_bounds = array<i64: 1, 128>}, {transform_indices = @transform_3, window_bounds = array<i64: 2, 80>}]} {
    %c0 = arith.constant 0 : index
    %c0_0 = arith.constant 0 : index
    %0 = vector.load %arg1[%c0, %c0_0] : memref<2x768xf32, #tpu.memory_space<vmem>>, vector<2x768xf32>
    %1 = arith.truncf %0 : vector<2x768xf32> to vector<2x768xbf16>
    %c0_1 = arith.constant 0 : index
    %c0_2 = arith.constant 0 : index
    %2 = vector.load %arg2[%c0_1, %c0_2] : memref<768x128xbf16, #tpu.memory_space<vmem>>, vector<768x128xbf16>
    %cst = arith.constant dense<0.000000e+00> : vector<2x128xf32>
    %3 = tpu.matmul %1, %2, %cst {dimension_numbers = #tpu.dot_dimension_numbers<[1], [0], [0], [1], [0, 0, 1, 1], [], []>} : vector<2x768xbf16>, vector<768x128xbf16>, vector<2x128xf32> -> vector<2x128xf32>
    %c0_3 = arith.constant 0 : index
    %c0_4 = arith.constant 0 : index
    %4 = vector.load %arg3[%c0_3, %c0_4] : memref<1x128xf32, #tpu.memory_space<vmem>>, vector<1x128xf32>
    %5 = vector.broadcast %4 : vector<1x128xf32> to vector<2x128xf32>
    %6 = arith.addf %3, %5 : vector<2x128xf32>
    %cst_5 = arith.constant dense<0xFF800000> : vector<2xf32>
    %7 = vector.multi_reduction <maximumf>, %6, %cst_5 [1] : vector<2x128xf32> to vector<2xf32>
    %8 = vector.shape_cast %7 : vector<2xf32> to vector<2x1xf32>
    %9 = vector.broadcast %8 : vector<2x1xf32> to vector<2x128xf32>
    %10 = arith.subf %6, %9 : vector<2x128xf32>
    %11 = math.exp %10 : vector<2x128xf32>
    %cst_6 = arith.constant dense<0.000000e+00> : vector<2xf32>
    %12 = vector.multi_reduction <add>, %11, %cst_6 [1] : vector<2x128xf32> to vector<2xf32>
    %13 = vector.shape_cast %12 : vector<2xf32> to vector<2x1xf32>
    %14 = vector.broadcast %13 : vector<2x1xf32> to vector<2x128xf32>
    %15 = arith.divf %11, %14 : vector<2x128xf32>
    %16 = vector.extract_strided_slice %15 {offsets = [0, 0], sizes = [2, 80], strides = [1, 1]} : vector<2x128xf32> to vector<2x80xf32>
    %c0_7 = arith.constant 0 : index
    %c0_8 = arith.constant 0 : index
    %17 = vector.load %arg4[%c0_7, %c0_8] : memref<2x80xf32, #tpu.memory_space<vmem>>, vector<2x80xf32>
    tpu.vector_store %arg4[%c0_7, %c0_8], %16 {strides = array<i32>} : memref<2x80xf32, #tpu.memory_space<vmem>>, vector<2x80xf32>,
    return
  }
  func.func @transform_0(%arg0: i32) -> (i32, i32) {
    %c0_i32 = arith.constant 0 : i32
    %c0_i32_0 = arith.constant 0 : i32
    return %arg0, %c0_i32 : i32, i32
  }
  func.func @transform_1(%arg0: i32) -> (i32, i32) {
    %c0_i32 = arith.constant 0 : i32
    %c0_i32_0 = arith.constant 0 : i32
    %c0_i32_1 = arith.constant 0 : i32
    return %c0_i32, %c0_i32_0 : i32, i32
  }
  func.func @transform_2(%arg0: i32) -> (i32, i32) {
    %c0_i32 = arith.constant 0 : i32
    %c0_i32_0 = arith.constant 0 : i32
    %c0_i32_1 = arith.constant 0 : i32
    return %c0_i32, %c0_i32_0 : i32, i32
  }
  func.func @transform_3(%arg0: i32) -> (i32, i32) {
    %c0_i32 = arith.constant 0 : i32
    %c0_i32_0 = arith.constant 0 : i32
    return %arg0, %c0_i32 : i32, i32
  }
}

</mosaic_0001>

<bundles_post_ra>
// kernel: cta_model_forward.1
= control target key start
LH: loop header
LB: loop body
LE: loop exit
PB: predicated region body
PF: predicated region fallthrough
CT: control target
= control target key end

     0   :  { %8 = vsyncpa [#allocation3], 0  ;;  %s906_s0 = inlined_call_operand.vmem [shape: f32[2,768], index: 0, kind: input, shape index: {}]   ;;  %s907_s1 = inlined_call_operand.hbm [shape: bf16[768,128], index: 1, kind: input, shape index: {}]   ;;  %s908_s2 = inlined_call_operand.vmem [shape: f32[1,128], index: 2, kind: input, shape index: {}]   ;;  %s909_s3 = inlined_call_operand.hbm [shape: f32[2,80], index: 3, kind: output, shape index: {}]  }
   0x1   :  { %9 = vsyncpa [#allocation4], 0  ;;  %s16_s14 = sshll.u32 %s907_s1, 4  ;;  %s867_s15 = smov [#allocation2]   ;;  %s17_s14 = int_to_ptr.hbm [resolvable:$true] %s16_s14 }
   0x2   :  { %s18_s16 = sshll.u32 %s867_s15, 4  ;;  %s868_s17 = smov 64   ;;  %s19_s16 = int_to_ptr.vmem [resolvable:$true] %s18_s16 }
   0x3   :  { %s869_s18 = smov 4  }
   0x4   :  { %24 = dma.hbm_to_vmem [thread:$0]  %s17_s14, 6144, %s19_s16, [#allocation3], %s868_s17, %s868_s17, %s869_s18  }
   0x5   :  { %863 = dma.done.wait [#allocation3], 6144  }
   0x6   :  { %864 = vsyncadd [#allocation3], 4294961152  ;;  %v765_v0 = vld [vmem:[#allocation2 + $0x38] sm:$0xff]  ;;  %v764_v2 = vld [vmem:[#allocation2 + $0x30] sm:$0xff]  ;;  %vm522_vm0 = vcmask 1041408   ;;  %s556_s26 = sshll.u32 %s909_s3, 4  ;;  %s557_s26 = int_to_ptr.hbm [resolvable:$true] %s556_s26 }
   0x7   :  { %v773_v1 = vld [vmem:[#allocation2 + $0x78] sm:$0xff]  ;;  %444 = vmatpush.bf16.msra.mxu0 %v765_v0  ;;  %v772_v3 = vld [vmem:[#allocation2 + $0x70] sm:$0xff]  ;;  %v763_v8 = vld [vmem:[#allocation2 + $0x28] sm:$0xff]  ;;  %vm547_vm5 = vcmask 648192  }
   0x8   :  { %457 = vmatpush.bf16.msra.mxu1 %v773_v1  ;;  %v781_v4 = vld [vmem:[#allocation2 + $0xb8] sm:$0xff]  ;;  %v780_v6 = vld [vmem:[#allocation2 + $0xb0] sm:$0xff]  ;;  %v771_v9 = vld [vmem:[#allocation2 + $0x68] sm:$0xff] }
   0x9   :  { %v789_v5 = vld [vmem:[#allocation2 + $0xf8] sm:$0xff]  ;;  %470 = vmatpush.bf16.msra.mxu2 %v781_v4  ;;  %v788_v7 = vld [vmem:[#allocation2 + $0xf0] sm:$0xff]  ;;  %v779_v10 = vld [vmem:[#allocation2 + $0xa8] sm:$0xff] }
   0xa   :  { %483 = vmatpush.bf16.msra.mxu3 %v789_v5  ;;  %v787_v11 = vld [vmem:[#allocation2 + $0xe8] sm:$0xff]  ;;  %v762_v12 = vld [vmem:[#allocation2 + $0x20] sm:$0xff]  ;;  %v31_v14 = vld [vmem:[%s906_s0] sm:$0xff] }
   0xb   :  { %445 = vmatpush.bf16.msra.mxu0 %v764_v2  ;;  %v770_v13 = vld [vmem:[#allocation2 + $0x60] sm:$0xff]  ;;  %35 = vst [vmem:[#allocation1] ss:$4 sm:$0xff] %v31_v14  ;;  %v761_v17 = vld [vmem:[#allocation2 + $0x18] sm:$0xff]  ;;  %v760_v21 = vld [vmem:[#allocation2 + $0x10] sm:$0xff] }
   0xc   :  { %458 = vmatpush.bf16.msra.mxu1 %v772_v3  ;;  %v778_v15 = vld [vmem:[#allocation2 + $0xa0] sm:$0xff]  ;;  %v769_v18 = vld [vmem:[#allocation2 + $0x58] sm:$0xff]  ;;  %v768_v22 = vld [vmem:[#allocation2 + $0x50] sm:$0xff] }
   0xd   :  { %471 = vmatpush.bf16.msra.mxu2 %v780_v6  ;;  %v786_v16 = vld [vmem:[#allocation2 + $0xe0] sm:$0xff]  ;;  %v777_v19 = vld [vmem:[#allocation2 + $0x98] sm:$0xff]  ;;  %v776_v23 = vld [vmem:[#allocation2 + $0x90] sm:$0xff] }
   0xe   :  { %484 = vmatpush.bf16.msra.mxu3 %v788_v7  ;;  %v785_v20 = vld [vmem:[#allocation2 + $0xd8] sm:$0xff]  ;;  %v784_v24 = vld [vmem:[#allocation2 + $0xd0] sm:$0xff]  ;;  %v32_v25 = vld [vmem:[%s906_s0 + $0x8] sm:$0xf] }
   0xf   :  { %446 = vmatpush.bf16.msra.mxu0 %v763_v8  ;;  %v759_v26 = vld [vmem:[#allocation2 + $0x8] sm:$0xff]  ;;  %37 = vst [vmem:[#allocation1 + $0x20] ss:$4 sm:$0xff] %v32_v25  ;;  %v758_v29 = vld [vmem:[#allocation2] sm:$0xff]  ;;  %v797_v34 = vld [vmem:[#allocation2 + $0x138] sm:$0xff] }
  0x10   :  { %459 = vmatpush.bf16.msra.mxu1 %v771_v9  ;;  %v767_v27 = vld [vmem:[#allocation2 + $0x48] sm:$0xff]  ;;  %v766_v30 = vld [vmem:[#allocation2 + $0x40] sm:$0xff]  ;;  %v805_v35 = vld [vmem:[#allocation2 + $0x178] sm:$0xff] }
  0x11   :  { %472 = vmatpush.bf16.msra.mxu2 %v779_v10  ;;  %v775_v28 = vld [vmem:[#allocation2 + $0x88] sm:$0xff]  ;;  %v774_v36 = vld [vmem:[#allocation2 + $0x80] sm:$0xff]  ;;  %v796_v42 = vld [vmem:[#allocation2 + $0x130] sm:$0xff] }
  0x12   :  { %485 = vmatpush.bf16.msra.mxu3 %v787_v11  ;;  %v783_v31 = vld [vmem:[#allocation2 + $0xc8] sm:$0xff]  ;;  %v38_v32 = vld.sshfl [vmem:[#allocation1] sm:$0xff pattern:$0x73625140]  ;;  %v782_v40 = vld [vmem:[#allocation2 + $0xc0] sm:$0xff] }
  0x13   :  { %447 = vmatpush.bf16.msra.mxu0 %v762_v12  ;;  %v39_v33 = vld.sshfl [vmem:[#allocation1 + $0x8] sm:$0xff pattern:$0x73625140]  ;;  %v50_v37 = vpack.c.bf16 %v38_v32, %v38_v32  ;;  %v40_v39 = vld.sshfl [vmem:[#allocation1 + $0x10] sm:$0xff pattern:$0x73625140] }
  0x14   :  { %460 = vmatpush.bf16.msra.mxu1 %v770_v13  ;;  %v51_v38 = vpack.c.bf16 %v39_v33, %v39_v33  ;;  %v41_v41 = vld.sshfl [vmem:[#allocation1 + $0x18] sm:$0xff pattern:$0x73625140]  ;;  %v52_v44 = vpack.c.bf16 %v40_v39, %v40_v39  ;;  %v795_v46 = vld [vmem:[#allocation2 + $0x128] sm:$0xff]  ;;  %v794_v48 = vld [vmem:[#allocation2 + $0x120] sm:$0xff] }
  0x15   :  { %473 = vmatpush.bf16.msra.mxu2 %v778_v15  ;;  %v804_v43 = vld [vmem:[#allocation2 + $0x170] sm:$0xff]  ;;  %v53_v45 = vpack.c.bf16 %v41_v41, %v41_v41  ;;  %v803_v47 = vld [vmem:[#allocation2 + $0x168] sm:$0xff]  ;;  %v802_v49 = vld [vmem:[#allocation2 + $0x160] sm:$0xff] }
  0x16   :  { %486 = vmatpush.bf16.msra.mxu3 %v786_v16  ;;  %v793_v50 = vld [vmem:[#allocation2 + $0x118] sm:$0xff]  ;;  %v792_v52 = vld [vmem:[#allocation2 + $0x110] sm:$0xff]  ;;  %v791_v54 = vld [vmem:[#allocation2 + $0x108] sm:$0xff] }
  0x17   :  { %448 = vmatpush.bf16.msra.mxu0 %v761_v17  ;;  %v801_v51 = vld [vmem:[#allocation2 + $0x158] sm:$0xff]  ;;  %v800_v53 = vld [vmem:[#allocation2 + $0x150] sm:$0xff]  ;;  %v799_v55 = vld [vmem:[#allocation2 + $0x148] sm:$0xff] }
  0x18   :  { %461 = vmatpush.bf16.msra.mxu1 %v769_v18  ;;  %v790_v56 = vld [vmem:[#allocation2 + $0x100] sm:$0xff]  ;;  %v42_v58 = vld.sshfl [vmem:[#allocation1 + $0x20] sm:$0xff pattern:$0x73625140] }
  0x19   :  { %474 = vmatpush.bf16.msra.mxu2 %v777_v19  ;;  %v798_v57 = vld [vmem:[#allocation2 + $0x140] sm:$0xff]  ;;  %v54_v60 = vpack.c.bf16 %v42_v58, %v42_v58  ;;  %v810_v4 = vld [vmem:[%s908_s2] ss:$0 sm:$0xff]  ;;  %s870_s2 = smov [#allocation5]  }
  0x1a   :  { %487 = vmatpush.bf16.msra.mxu3 %v785_v20  ;;  %v43_v59 = vld.sshfl [vmem:[#allocation1 + $0x28] sm:$0xff pattern:$0x73625140]  ;;  %s554_s23 = sshll.u32 %s870_s2, 4  ;;  %s555_s23 = int_to_ptr.vmem [resolvable:$true] %s554_s23 }
  0x1b   :  { %449 = vmatpush.bf16.msra.mxu0 %v760_v21  ;;  %v55_v61 = vpack.c.bf16 %v43_v59, %v43_v59 }
  0x1c   :  { %462 = vmatpush.bf16.msra.mxu1 %v768_v22 }
  0x1d   :  { %475 = vmatpush.bf16.msra.mxu2 %v776_v23 }
  0x1e   :  { %488 = vmatpush.bf16.msra.mxu3 %v784_v24 }
  0x1f   :  { %450 = vmatpush.bf16.msra.mxu0 %v759_v26 }
  0x20   :  { %463 = vmatpush.bf16.msra.mxu1 %v767_v27 }
  0x21   :  { %476 = vmatpush.bf16.msra.mxu2 %v775_v28 }
  0x22   :  { %489 = vmatpush.bf16.msra.mxu3 %v783_v31 }
  0x23   :  { %451 = vmatpush.bf16.msra.mxu0 %v758_v29 }
  0x24   :  { %464 = vmatpush.bf16.msra.mxu1 %v766_v30 }
  0x25   :  { %477 = vmatpush.bf16.msra.mxu2 %v774_v36 }
  0x26   :  { %452 = vmatmul.bf16.vlgmr.msra.gmra.mxu0 %v50_v37  ;;  %490 = vmatpush.bf16.msra.mxu3 %v782_v40 }
  0x27   :  { %496 = vmatpush.bf16.msrb.mxu0 %v797_v34  ;;  %465 = vmatmul.bf16.vlgmr.msra.gmra.mxu1 %v51_v38 }
  0x28   :  { %509 = vmatpush.bf16.msrb.mxu1 %v805_v35  ;;  %478 = vmatmul.bf16.vlgmr.msra.gmra.mxu2 %v52_v44 }
  0x29   :  { %491 = vmatmul.bf16.vlgmr.msra.gmra.mxu3 %v53_v45 }
  0x2b   :  { %497 = vmatpush.bf16.msrb.mxu0 %v796_v42 }
  0x2c   :  { %510 = vmatpush.bf16.msrb.mxu1 %v804_v43 }
  0x2f   :  { %498 = vmatpush.bf16.msrb.mxu0 %v795_v46 }
  0x30   :  { %511 = vmatpush.bf16.msrb.mxu1 %v803_v47 }
  0x33   :  { %499 = vmatpush.bf16.msrb.mxu0 %v794_v48 }
  0x34   :  { %512 = vmatpush.bf16.msrb.mxu1 %v802_v49 }
  0x37   :  { %500 = vmatpush.bf16.msrb.mxu0 %v793_v50 }
  0x38   :  { %513 = vmatpush.bf16.msrb.mxu1 %v801_v51 }
  0x3b   :  { %501 = vmatpush.bf16.msrb.mxu0 %v792_v52 }
  0x3c   :  { %514 = vmatpush.bf16.msrb.mxu1 %v800_v53 }
  0x3f   :  { %502 = vmatpush.bf16.msrb.mxu0 %v791_v54 }
  0x40   :  { %515 = vmatpush.bf16.msrb.mxu1 %v799_v55 }
  0x43   :  { %503 = vmatpush.bf16.msrb.mxu0 %v790_v56 }
  0x44   :  { %516 = vmatpush.bf16.msrb.mxu1 %v798_v57 }
  0x46   :  { %504 = vmatmul.bf16.vlgmr.msrb.gmra.mxu0 %v54_v60 }
  0x47   :  { %517 = vmatmul.bf16.vlgmr.msrb.gmra.mxu1 %v55_v61 }
  0xa3   :  { %v453_v62 = vpop.f32.mrf.mxu0 }
  0xa4   :  { %v466_v63 = vpop.f32.mrf.mxu1  ;;  %v454_v5 = vadd.f32 %v810_v4, %v453_v62 }
  0xa6   :  { %v467_v8 = vadd.f32 %v466_v63, %v454_v5 }
  0xab   :  { %v455_v0 = vpop.f32.mrf.mxu0  ;;  %v479_v2 = vpop.f32.mrf.mxu2 }
  0xac   :  { %v468_v1 = vpop.f32.mrf.mxu1  ;;  %v492_v3 = vpop.f32.mrf.mxu3  ;;  %v480_v9 = vadd.f32 %v479_v2, %v467_v8 }
  0xae   :  { %v493_v10 = vadd.f32 %v492_v3, %v480_v9 }
  0xb3   :  { %v481_v6 = vpop.f32.mrf.mxu2 }
  0xb4   :  { %v494_v7 = vpop.f32.mrf.mxu3 }
  0xc3   :  { %v505_v11 = vpop.f32.mrf.mxu0 }
  0xc4   :  { %v518_v12 = vpop.f32.mrf.mxu1  ;;  %v506_v13 = vadd.f32 %v505_v11, %v493_v10 }
  0xc6   :  { %v519_v14 = vadd.f32 %v518_v12, %v506_v13 }
  0xc8   :  { %v523_v15 = vsel %vm522_vm0, %v519_v14, -inf }
  0xc9   :  { %524 = vmax.xlane.f32.xlu0 %v523_v15 }
  0xcb   :  { %v507_v16 = vpop.f32.mrf.mxu0 }
  0xcc   :  { %v520_v17 = vpop.f32.mrf.mxu1 }
 0x13c   :  { %v525_v18 = vpop.xlane.xlu0 %524 }
 0x13d   :  { %v526_v19 = vsub.f32 %v519_v14, %v525_v18 }
 0x13f   :  { %v527_v20 = vmul.f32 1.442695, %v526_v19 }
 0x141   :  { %811 = vpow2.f32 %v527_v20 }
 0x147   :  { %v812_v21 = vpop.eup %811 }
 0x148   :  { %v529_v22 = vsel %vm522_vm0, %v812_v21, 0.0 }
 0x149   :  { %530 = vadd.xlane.f32.xlu0 %v529_v22 }
 0x1bc   :  { %v531_v23 = vpop.xlane.xlu0 %530 }
 0x1bd   :  { %813 = vrcp.f32 %v531_v23  ;;  %v543_v27 = vand.u32 2147483648, %v531_v23  ;;  %v541_v29 = vand.u32 2147483647, %v531_v23  ;;  %vm537_vm2 = vweird.f32 %v531_v23 }
 0x1bf   :  { %v544_v31 = vor.u32 1.1754944e-38, %v543_v27  ;;  %vm542_vm4 = vcmp.eq.f32.partialorder %v541_v29, 8.507059e+37 }
 0x1c3   :  { %v814_v24 = vpop.eup %813 }
 0x1c4   :  { %v533_v25 = vmul.f32 %v814_v24, %v531_v23  ;;  %vm538_vm1 = vweird.f32 %v814_v24 }
 0x1c5   :  { %vm539_vm3 = vmor %vm537_vm2, %vm538_vm1 }
 0x1c6   :  { %v534_v26 = vsub.f32 1.0, %v533_v25 }
 0x1c8   :  { %v535_v28 = vmul.f32 %v814_v24, %v534_v26 }
 0x1ca   :  { %v536_v30 = vadd.f32 %v814_v24, %v535_v28 }
 0x1cc   :  { %v540_v32 = vsel %vm539_vm3, %v814_v24, %v536_v30 }
 0x1cd   :  { %v545_v33 = vsel %vm542_vm4, %v544_v31, %v540_v32 }
 0x1ce   :  { %v546_v34 = vmul.f32 %v812_v21, %v545_v33 }
 0x1d0   :  { %548 = vst.msk [vmem:[#allocation5] sm:$0x3] %vm547_vm5, %v546_v34 }
 0x1d1   :  { %559 = dma.vmem_to_hbm [thread:$0]  %s555_s23, 32, %s557_s26, [#allocation4]  }
 0x1d2   :  { %865 = dma.done.wait [#allocation4], 32  }
 0x1d3   :  { %866 = vsyncadd [#allocation4], 4294967264 }
 0x1d4   :  { %564 = vsyncpa [#allocation3], 1 }
 0x1d5   :  { %565 = vsyncpa [#allocation4], 1 }

</bundles_post_ra>
